<compile_context>
chip_gen: v6e
topology: v6e:2x2x1
jax: 0.10.0
libtpu: 0.0.40
codegen_flags: <defaults>
</compile_context>

<pallas_src>
import math

import jax
import jax.numpy as jnp
from jax.experimental import pallas as pl
from jax.experimental.pallas import tpu as pltpu


def _spectral_conv_kernel(x_ref, fcat_ref, g_ref, out_ref):
    """Fused truncated-rfft -> complex mix -> truncated-irfft for one M tile.

    x_ref    : (TM, E*N)      input tile, channels on contiguous lane ranges
    fcat_ref : (N, 2*modes)   [cos | -sin] forward DFT basis (resident)
    g_ref    : (E*2m, O*N)    weights fused with inverse DFT basis (resident)
    out_ref  : (TM, O*N)      lane-dense output slab
    """
    N, two_m = fcat_ref.shape
    E = g_ref.shape[0] // two_m

    fcat = fcat_ref[...]

    # Stage 1: truncated rFFT per input channel.  Each matmul contracts over
    # the full length N and produces [Re X_i | Im X_i] on 2m lanes; the E
    # results are lane-concatenated into one (TM, E*2m) activation.
    a_parts = [
        jnp.dot(x_ref[:, i * N:(i + 1) * N], fcat,
                preferred_element_type=jnp.float32)
        for i in range(E)
    ]
    a_cat = jnp.concatenate(a_parts, axis=-1) if E > 1 else a_parts[0]

    # Stage 2: complex channel mixing + truncated iRFFT as ONE deep MXU
    # matmul (K = E*2m) against the precomputed G; result stored directly.
    out_ref[...] = jnp.dot(a_cat, g_ref[...],
                           preferred_element_type=jnp.float32)


def _choose_tm(m, per_row_bytes, fixed_bytes, budget=16 * 1024 * 1024):
    """Tile of the B*H axis: largest multiple of 8 that fits the VMEM block
    budget (resident blocks + double-buffered x/out + temporaries), capped so
    the grid has >= 2 steps whenever there is enough work (v7x: 2 TCs)."""
    if m <= 8:
        return m                      # full-extent block, always legal
    avail = budget - fixed_bytes
    cap = max(8, avail // max(per_row_bytes, 1))
    tm = min(m, cap)
    tm = max(8, (tm // 8) * 8)        # sublane granularity
    if m >= 16:
        half = max(8, (((m + 1) // 2) + 7) // 8 * 8)   # ~ceil(m/2), 8-aligned
        tm = min(tm, half)            # guarantee >= 2 parallel grid steps
    return tm


@jax.jit
def spectral_conv1d_forward(x, weights_real, weights_imag):
    """x: (B, H, E, N) float32; weights: (E, O, modes) float32 each."""
    B, H, E, N = x.shape
    _, O, modes = weights_real.shape
    assert modes <= N // 2, "modes must exclude the Nyquist bin"
    M = B * H

    # ---- DFT bases (functions of N, modes only) ----
    n = jnp.arange(N, dtype=jnp.float32)
    k = jnp.arange(modes, dtype=jnp.float32)
    theta = (2.0 * math.pi / N) * jnp.outer(n, k)                      # (N, m)
    fcat = jnp.concatenate([jnp.cos(theta), -jnp.sin(theta)], axis=1)  # (N, 2m)
    coef = jnp.where(jnp.arange(modes) == 0, 1.0, 2.0).astype(jnp.float32)
    cinv = coef[:, None] * jnp.cos(theta.T) / N                        # (m, N)
    sinv = -coef[:, None] * jnp.sin(theta.T) / N                       # (m, N)

    # ---- Fuse spectral weights with the inverse basis: G (E*2m, O*N) ----
    # out[m,o,:] = sum_i  Ar_i @ (wr*cinv + wi*sinv)  +  Ai_i @ (wr*sinv - wi*cinv)
    wr = weights_real.astype(jnp.float32)
    wi = weights_imag.astype(jnp.float32)
    gr = (jnp.einsum('iok,kn->ikon', wr, cinv)
          + jnp.einsum('iok,kn->ikon', wi, sinv))                      # (E, m, O, N)
    gi = (jnp.einsum('iok,kn->ikon', wr, sinv)
          - jnp.einsum('iok,kn->ikon', wi, cinv))                      # (E, m, O, N)
    g = jnp.concatenate([gr, gi], axis=1).reshape(E * 2 * modes, O * N)

    # ---- Activations: contiguous reshape only (NO HBM transpose) ----
    x2d = x.reshape(M, E * N).astype(jnp.float32)                      # (M, E*N)

    # ---- VMEM-aware tile of the B*H axis ----
    # per TM row: x block (x2), out block (x2) + matmul result, A temporaries
    per_row = 4 * (2 * E * N + 3 * O * N + 2 * (2 * E * modes))
    # resident blocks (count worst-case double buffering): fcat + G
    fixed = 4 * 2 * (N * 2 * modes + (E * 2 * modes) * (O * N))
    TM = _choose_tm(M, per_row, fixed)
    grid = (pl.cdiv(M, TM),)          # partial last block handled by Pallas

    out_flat = pl.pallas_call(
        _spectral_conv_kernel,
        out_shape=jax.ShapeDtypeStruct((M, O * N), jnp.float32),
        grid_spec=pltpu.PrefetchScalarGridSpec(
            num_scalar_prefetch=0,
            grid=grid,
            in_specs=[
                pl.BlockSpec((TM, E * N), lambda m: (m, 0)),
                pl.BlockSpec((N, 2 * modes), lambda m: (0, 0)),          # resident
                pl.BlockSpec((E * 2 * modes, O * N), lambda m: (0, 0)),  # resident
            ],
            out_specs=pl.BlockSpec((TM, O * N), lambda m: (m, 0)),
        ),
        compiler_params=pltpu.CompilerParams(
            dimension_semantics=("parallel",),       # M tiles across TCs
            vmem_limit_bytes=32 * 1024 * 1024),
    )(x2d, fcat, g)

    return out_flat.reshape(B, H, O, N)


class SpectralConv1d:
    """JAX/Pallas port of model/FiLM.py::SpectralConv1d (forward only)."""

    def __init__(self, in_channels, out_channels, seq_len, ratio=0.5, *, key):
        self.in_channels = in_channels
        self.out_channels = out_channels
        self.ratio = ratio
        self.modes = min(32, seq_len // 2)
        self.scale = 1.0 / (in_channels * out_channels)
        k1, k2 = jax.random.split(key)
        wshape = (in_channels, out_channels, self.modes)
        # deterministic synthetic params, same distribution as torch.rand * scale
        self.weights_real = self.scale * jax.random.uniform(k1, wshape, jnp.float32)
        self.weights_imag = self.scale * jax.random.uniform(k2, wshape, jnp.float32)

    def __call__(self, x):
        return spectral_conv1d_forward(x, self.weights_real, self.weights_imag)


def _reference_forward(x, weights_real, weights_imag, modes, out_channels):
    """Pure-jnp reference mirroring the PyTorch forward exactly."""
    B, H, E, N = x.shape
    F = N // 2 + 1
    x_ft = jnp.fft.rfft(x, axis=-1)
    a = x_ft[..., :modes]
    yr = (jnp.einsum('bjix,iox->bjox', jnp.real(a), weights_real)
          - jnp.einsum('bjix,iox->bjox', jnp.imag(a), weights_imag))
    yi = (jnp.einsum('bjix,iox->bjox', jnp.real(a), weights_imag)
          + jnp.einsum('bjix,iox->bjox', jnp.imag(a), weights_real))
    out_ft = jnp.zeros((B, H, out_channels, F), jnp.complex64)
    out_ft = out_ft.at[..., :modes].set((yr + 1j * yi).astype(jnp.complex64))
    return jnp.fft.irfft(out_ft, n=N, axis=-1)


def _run_case(key, B, H, in_ch, out_ch, seq_len):
    k_x, k_w = jax.random.split(key)
    x = jax.random.normal(k_x, (B, H, in_ch, seq_len), jnp.float32)
    layer = SpectralConv1d(in_ch, out_ch, seq_len, key=k_w)

    out = jax.block_until_ready(layer(x))
    ref = jax.block_until_ready(
        _reference_forward(x, layer.weights_real, layer.weights_imag,
                           layer.modes, out_ch))

    assert out.shape == (B, H, out_ch, seq_len), out.shape
    assert out.dtype == jnp.float32, out.dtype
    assert bool(jnp.all(jnp.isfinite(out)))
    # DFT-basis matmuls vs jnp.fft differ only by f32 rounding; 1e-4 is ample.
    assert bool(jnp.allclose(out, ref, atol=1e-4, rtol=1e-4))


if __name__ == "__main__":
    key = jax.random.PRNGKey(0)
    k1, k2 = jax.random.split(key)

    # Primary small case (matches the module defaults): single-tile grid.
    _run_case(k1, B=2, H=4, in_ch=4, out_ch=4, seq_len=16)
    # Second case exercises a multi-step "parallel" grid (M=32 -> >=2 tiles),
    # non-power-of-two channel counts, and modes == N//2.
    _run_case(k2, B=4, H=8, in_ch=3, out_ch=5, seq_len=64)

    print("KERNEL_OK")
</pallas_src>

<mosaic_0001>
module attributes {stable_mosaic.version = 11 : i64} {
  func.func @_spectral_conv_kernel(%arg0: i32, %arg1: memref<8x64xf32, #tpu.memory_space<vmem>>, %arg2: memref<16x16xf32, #tpu.memory_space<vmem>>, %arg3: memref<64x64xf32, #tpu.memory_space<vmem>>, %arg4: memref<8x64xf32, #tpu.memory_space<vmem>>) attributes {dimension_semantics = [#tpu.dimension_semantics<parallel>], iteration_bounds = array<i64: 1>, scalar_prefetch = 0 : i64, scratch_operands = 0 : i64, tpu.core_type = #tpu.core_type<tc>, window_params = [{transform_indices = @transform_0, window_bounds = array<i64: 8, 64>}, {pipeline_mode = #tpu.pipeline_mode<synchronous>, transform_indices = @transform_1, window_bounds = array<i64: 16, 16>}, {pipeline_mode = #tpu.pipeline_mode<synchronous>, transform_indices = @transform_2, window_bounds = array<i64: 64, 64>}, {transform_indices = @transform_3, window_bounds = array<i64: 8, 64>}]} {
    %c0 = arith.constant 0 : index
    %c0_0 = arith.constant 0 : index
    %0 = vector.load %arg2[%c0, %c0_0] : memref<16x16xf32, #tpu.memory_space<vmem>>, vector<16x16xf32>
    %c0_1 = arith.constant 0 : index
    %c0_2 = arith.constant 0 : index
    %1 = vector.load %arg1[%c0_1, %c0_2] : memref<8x64xf32, #tpu.memory_space<vmem>>, vector<8x16xf32>
    %cst = arith.constant dense<0.000000e+00> : vector<8x16xf32>
    %2 = tpu.matmul %1, %0, %cst {dimension_numbers = #tpu.dot_dimension_numbers<[1], [0], [0], [1], [0, 0, 1, 1], [], []>} : vector<8x16xf32>, vector<16x16xf32>, vector<8x16xf32> -> vector<8x16xf32>
    %c0_3 = arith.constant 0 : index
    %c16 = arith.constant 16 : index
    %3 = vector.load %arg1[%c0_3, %c16] : memref<8x64xf32, #tpu.memory_space<vmem>>, vector<8x16xf32>
    %cst_4 = arith.constant dense<0.000000e+00> : vector<8x16xf32>
    %4 = tpu.matmul %3, %0, %cst_4 {dimension_numbers = #tpu.dot_dimension_numbers<[1], [0], [0], [1], [0, 0, 1, 1], [], []>} : vector<8x16xf32>, vector<16x16xf32>, vector<8x16xf32> -> vector<8x16xf32>
    %c0_5 = arith.constant 0 : index
    %c32 = arith.constant 32 : index
    %5 = vector.load %arg1[%c0_5, %c32] : memref<8x64xf32, #tpu.memory_space<vmem>>, vector<8x16xf32>
    %cst_6 = arith.constant dense<0.000000e+00> : vector<8x16xf32>
    %6 = tpu.matmul %5, %0, %cst_6 {dimension_numbers = #tpu.dot_dimension_numbers<[1], [0], [0], [1], [0, 0, 1, 1], [], []>} : vector<8x16xf32>, vector<16x16xf32>, vector<8x16xf32> -> vector<8x16xf32>
    %c0_7 = arith.constant 0 : index
    %c48 = arith.constant 48 : index
    %7 = vector.load %arg1[%c0_7, %c48] : memref<8x64xf32, #tpu.memory_space<vmem>>, vector<8x16xf32>
    %cst_8 = arith.constant dense<0.000000e+00> : vector<8x16xf32>
    %8 = tpu.matmul %7, %0, %cst_8 {dimension_numbers = #tpu.dot_dimension_numbers<[1], [0], [0], [1], [0, 0, 1, 1], [], []>} : vector<8x16xf32>, vector<16x16xf32>, vector<8x16xf32> -> vector<8x16xf32>
    %9 = tpu.concatenate %2, %4, %6, %8 in 1 : vector<8x16xf32>, vector<8x16xf32>, vector<8x16xf32>, vector<8x16xf32> -> vector<8x64xf32>
    %c0_9 = arith.constant 0 : index
    %c0_10 = arith.constant 0 : index
    %10 = vector.load %arg3[%c0_9, %c0_10] : memref<64x64xf32, #tpu.memory_space<vmem>>, vector<64x64xf32>
    %cst_11 = arith.constant dense<0.000000e+00> : vector<8x64xf32>
    %11 = tpu.matmul %9, %10, %cst_11 {dimension_numbers = #tpu.dot_dimension_numbers<[1], [0], [0], [1], [0, 0, 1, 1], [], []>} : vector<8x64xf32>, vector<64x64xf32>, vector<8x64xf32> -> vector<8x64xf32>
    %c0_12 = arith.constant 0 : index
    %c0_13 = arith.constant 0 : index
    %12 = vector.load %arg4[%c0_12, %c0_13] : memref<8x64xf32, #tpu.memory_space<vmem>>, vector<8x64xf32>
    tpu.vector_store %arg4[%c0_12, %c0_13], %11 {strides = array<i32>} : memref<8x64xf32, #tpu.memory_space<vmem>>, vector<8x64xf32>,
    return
  }
  func.func @transform_0(%arg0: i32) -> (i32, i32) {
    %c0_i32 = arith.constant 0 : i32
    %c0_i32_0 = arith.constant 0 : i32
    return %arg0, %c0_i32 : i32, i32
  }
  func.func @transform_1(%arg0: i32) -> (i32, i32) {
    %c0_i32 = arith.constant 0 : i32
    %c0_i32_0 = arith.constant 0 : i32
    %c0_i32_1 = arith.constant 0 : i32
    return %c0_i32, %c0_i32_0 : i32, i32
  }
  func.func @transform_2(%arg0: i32) -> (i32, i32) {
    %c0_i32 = arith.constant 0 : i32
    %c0_i32_0 = arith.constant 0 : i32
    %c0_i32_1 = arith.constant 0 : i32
    return %c0_i32, %c0_i32_0 : i32, i32
  }
  func.func @transform_3(%arg0: i32) -> (i32, i32) {
    %c0_i32 = arith.constant 0 : i32
    %c0_i32_0 = arith.constant 0 : i32
    return %arg0, %c0_i32 : i32, i32
  }
}

</mosaic_0001>

<bundles_post_ra>
// kernel: spectral_conv1d_forward.1
= control target key start
LH: loop header
LB: loop body
LE: loop exit
PB: predicated region body
PF: predicated region fallthrough
CT: control target
= control target key end

     0   :  { %v498_v1 = vmov 0.0   ;;  %vm499_vm0 = vmmov 0   ;;  %s500_s16 = smov 112   ;;  %s501_s17 = smov 80   ;;  %vm17_vm1 = vcmask 130048   ;;  %vm326_vm2 = vcmask 261120   ;;  %s572_s0 = inlined_call_operand.vmem [shape: f32[8,64], index: 0, kind: input, shape index: {}]   ;;  %s573_s1 = inlined_call_operand.vmem [shape: f32[16,16], index: 1, kind: input, shape index: {}]   ;;  %s574_s2 = inlined_call_operand.vmem [shape: f32[64,64], index: 2, kind: input, shape index: {}]   ;;  %s575_s3 = inlined_call_operand.vmem [shape: f32[8,64], index: 3, kind: output, shape index: {}]  }
   0x1   :  { %v16_v0 = vld [vmem:[%s572_s0] sm:$0xff]  ;;  %443 = vmatprep.subr.mxu1 %v498_v1  ;;  %v15_v2 = vld [vmem:[%s573_s1 + $0x8] sm:$0xff]  ;;  %447 = vmatprep.mubr.msk.f32.mxu1 %vm499_vm0, %v498_v1  ;;  %s502_s0 = smov 96   ;;  %v337_v7 = vld [vmem:[%s574_s2 + $0x38] sm:$0xff]  ;;  %s503_s8 = smov 16   ;;  %vm328_vm3 = vcmask 392192  }
   0x2   :  { %91 = vrot.lane.b32.xlu0 %v16_v0, %s500_s16  ;;  %239 = vrot.lane.b32.xlu1 %v16_v0, %s501_s17  ;;  %v14_v3 = vld [vmem:[%s573_s1] sm:$0xff]  ;;  %v336_v8 = vld [vmem:[%s574_s2 + $0x30] sm:$0xff]  ;;  %s504_s9 = smov 32   ;;  %s505_s10 = smov 48   ;;  %vm338_vm4 = vcmask 523264  }
   0x3   :  { %444 = vmatpush3.msra.mxu1 %v15_v2  ;;  %471 = vmatprep.subr.mxu0 %v498_v1  ;;  %v335_v9 = vld [vmem:[%s574_s2 + $0x28] sm:$0xff]  ;;  %v334_v12 = vld [vmem:[%s574_s2 + $0x20] sm:$0xff]  ;;  %v333_v13 = vld [vmem:[%s574_s2 + $0x18] sm:$0xff] }
   0x4   :  { %445 = vmatprep.subr.mxu1 %v498_v1  ;;  %487 = vmatprep.mubr.msk.f32.mxu0 %vm499_vm0, %v498_v1  ;;  %v332_v14 = vld [vmem:[%s574_s2 + $0x10] sm:$0xff]  ;;  %v331_v15 = vld [vmem:[%s574_s2 + $0x8] sm:$0xff]  ;;  %v330_v16 = vld [vmem:[%s574_s2] sm:$0xff] }
   0x5   :  { %446 = vmatpush3.msra.mxu1 %v14_v3  ;;  %472 = vmatpush3.msra.mxu0 %v337_v7 }
   0x6   :  { %165 = vrot.lane.b32.xlu0 %v16_v0, %s502_s0  ;;  %448 = vmatmul.mubr.msk.f32.vlgmr.msra.gmra.mxu1 %vm17_vm1, %v16_v0 }
   0x7   :  { %450 = vmatprep.subr.mxu1 %v498_v1  ;;  %454 = vmatprep.mubr.msk.f32.mxu1 %vm499_vm0, %v498_v1 }
   0x8   :  { %451 = vmatpush3.msra.mxu1 %v15_v2  ;;  %473 = vmatprep.subr.mxu0 %v498_v1 }
   0x9   :  { %452 = vmatprep.subr.mxu1 %v498_v1  ;;  %474 = vmatpush3.msra.mxu0 %v336_v8 }
   0xa   :  { %453 = vmatpush3.msra.mxu1 %v14_v3  ;;  %475 = vmatprep.subr.mxu0 %v498_v1 }
   0xb   :  { %457 = vmatprep.subr.mxu1 %v498_v1  ;;  %476 = vmatpush3.msra.mxu0 %v335_v9 }
   0xc   :  { %477 = vmatprep.subr.mxu0 %v498_v1 }
   0xd   :  { %478 = vmatpush3.msra.mxu0 %v334_v12 }
   0xe   :  { %479 = vmatprep.subr.mxu0 %v498_v1 }
   0xf   :  { %480 = vmatpush3.msra.mxu0 %v333_v13 }
  0x10   :  { %481 = vmatprep.subr.mxu0 %v498_v1 }
  0x11   :  { %482 = vmatpush3.msra.mxu0 %v332_v14 }
  0x12   :  { %483 = vmatprep.subr.mxu0 %v498_v1 }
  0x13   :  { %484 = vmatpush3.msra.mxu0 %v331_v15 }
  0x14   :  { %485 = vmatprep.subr.mxu0 %v498_v1 }
  0x15   :  { %486 = vmatpush3.msra.mxu0 %v330_v16 }
  0x74   :  { %v92_v4 = vpop.permute.xlu0 %91  ;;  %v240_v6 = vpop.permute.xlu1 %239 }
  0x75   :  { %455 = vmatmul.mubr.msk.f32.vlgmr.msra.gmra.mxu1 %vm17_vm1, %v92_v4 }
  0x76   :  { %458 = vmatpush3.msra.mxu1 %v15_v2  ;;  %461 = vmatprep.mubr.msk.f32.mxu1 %vm499_vm0, %v498_v1 }
  0x77   :  { %459 = vmatprep.subr.mxu1 %v498_v1 }
  0x78   :  { %460 = vmatpush3.msra.mxu1 %v14_v3  ;;  %v166_v5 = vpop.permute.xlu0 %165 }
  0x79   :  { %464 = vmatprep.subr.mxu1 %v498_v1  ;;  %462 = vmatmul.mubr.msk.f32.vlgmr.msra.gmra.mxu1 %vm17_vm1, %v166_v5 }
  0x7a   :  { %465 = vmatpush3.msra.mxu1 %v15_v2  ;;  %468 = vmatprep.mubr.msk.f32.mxu1 %vm499_vm0, %v498_v1 }
  0x7b   :  { %466 = vmatprep.subr.mxu1 %v498_v1 }
  0x7c   :  { %467 = vmatpush3.msra.mxu1 %v14_v3 }
  0x7d   :  { %469 = vmatmul.mubr.msk.f32.vlgmr.msra.gmra.mxu1 %vm17_vm1, %v240_v6 }
  0xc6   :  { %v87_v10 = vpop.f32.mrf.mxu1 }
  0xc8   :  { %v449_v11 = vpop.f32.mrf.mxu1 }
 0x135   :  { %v161_v17 = vpop.f32.mrf.mxu1 }
 0x136   :  { %314 = vrot.lane.b32.xlu1 %v161_v17, %s503_s8 }
 0x137   :  { %v456_v18 = vpop.f32.mrf.mxu1 }
 0x139   :  { %v235_v19 = vpop.f32.mrf.mxu1 }
 0x13a   :  { %318 = vrot.lane.b32.xlu0 %v235_v19, %s504_s9 }
 0x13b   :  { %v463_v20 = vpop.f32.mrf.mxu1 }
 0x13d   :  { %v309_v21 = vpop.f32.mrf.mxu1 }
 0x13e   :  { %322 = vrot.lane.b32.xlu1 %v309_v21, %s505_s10 }
 0x13f   :  { %v470_v22 = vpop.f32.mrf.mxu1 }
 0x1a8   :  { %v315_v23 = vpop.permute.xlu1 %314 }
 0x1a9   :  { %v325_v25 = vsel %vm17_vm1, %v87_v10, %v315_v23 }
 0x1ac   :  { %v319_v24 = vpop.permute.xlu0 %318 }
 0x1ad   :  { %v327_v26 = vsel %vm326_vm2, %v325_v25, %v319_v24 }
 0x1b0   :  { %v323_v27 = vpop.permute.xlu1 %322 }
 0x1b1   :  { %v329_v28 = vsel %vm328_vm3, %v327_v26, %v323_v27 }
 0x1b2   :  { %488 = vmatmul.mubr.msk.f32.vlgmr.msra.gmra.mxu0 %vm338_vm4, %v329_v28 }
 0x272   :  { %v408_v29 = vpop.f32.mrf.mxu0 }
 0x273   :  { %412 = vst.msk [vmem:[%s575_s3] sm:$0xff] %vm338_vm4, %v408_v29 }
 0x274   :  { %v489_v30 = vpop.f32.mrf.mxu0 }

</bundles_post_ra>
